<compile_context>
chip_gen: v7x
topology: tpu7x:2x2x1
jax: 0.10.0
libtpu: 0.0.40
codegen_flags: <defaults>
</compile_context>

<pallas_src>
import numpy as np
import jax
import jax.numpy as jnp
from jax.experimental import pallas as pl
from jax.experimental.pallas import tpu as pltpu

EPS = 1e-5


# ----------------------------------------------------------------------------
# Kernel 1: fused per-timestep encoder (one row-tile of N per grid step).
#   conv (banded matmul) -> ReLU -> [pool+conv_out+combiner+BN1+BN2 folded]
#   -> SiLU -> LSTM input projection.  Pure 2-D matmuls, no in-kernel
#   reshapes/transposes, lane layouts stay trivial.
# ----------------------------------------------------------------------------
def encoder_kernel(x_ref, feats_ref, w_band_ref, b_conv_ref,
                   w_pc_ref, w_ff_ref, b_cmb_ref, w_ih_ref, b_lstm_ref,
                   gx_ref):
    # conv pre-activations for all (h, t_out) positions in one MXU pass + ReLU
    r = jnp.maximum(
        jnp.dot(x_ref[...], w_band_ref[...],
                preferred_element_type=jnp.float32) + b_conv_ref[...],
        0.0)                                                    # (tile_n, H*T_out)

    # average pool over time + conv_out/feat/combiner linears + both
    # BatchNorms, all folded on the host into two matmuls:
    #   c = r @ W_pc + feats @ W_ff + b
    c = (jnp.dot(r, w_pc_ref[...], preferred_element_type=jnp.float32)
         + jnp.dot(feats_ref[...], w_ff_ref[...],
                   preferred_element_type=jnp.float32)
         + b_cmb_ref[...])                                      # (tile_n, 10)
    z = c * jax.nn.sigmoid(c)                                   # SiLU

    # LSTM input projection hoisted out of the recurrent loop
    gx_ref[...] = (jnp.dot(z, w_ih_ref[...],
                           preferred_element_type=jnp.float32)
                   + b_lstm_ref[...])                           # (tile_n, 8)


# ----------------------------------------------------------------------------
# Kernel 2: LSTM(input=10, hidden=2, proj_size=1) -- single call, statically
# unrolled recurrence over S (small, static).  Input gates are precomputed and
# loaded into vregs once, so each step is pure VPU/EUP work.  Output written
# once, lane-dense along S.
# ----------------------------------------------------------------------------
def lstm_kernel(gx_ref, w_hh_ref, w_hr_ref, out_ref):
    n_seq, n_batch = gx_ref.shape[0], gx_ref.shape[1]
    gx = gx_ref[...]                                       # (S, B, 8) single load
    w_hh = w_hh_ref[...]                                   # (1, 8) = W_hh.T
    w_hr = w_hr_ref[...]                                   # (1, 2) projection
    lane = jax.lax.broadcasted_iota(jnp.int32, (1, n_seq), 1)

    h = jnp.zeros((n_batch, 1), jnp.float32)
    c = jnp.zeros((n_batch, 2), jnp.float32)
    out = jnp.zeros((n_batch, n_seq), jnp.float32)
    for s in range(n_seq):                                 # statically unrolled
        gates = gx[s] + h * w_hh                           # (B, 8)
        i = jax.nn.sigmoid(gates[:, 0:2])
        f = jax.nn.sigmoid(gates[:, 2:4])
        g = jnp.tanh(gates[:, 4:6])
        o = jax.nn.sigmoid(gates[:, 6:8])
        c = f * c + i * g                                  # (B, 2)
        h = jnp.sum(o * jnp.tanh(c) * w_hr, axis=-1, keepdims=True)   # (B, 1)
        out = jnp.where(lane == s, h, out)                 # place column s
    out_ref[...] = out                                     # single (B, S) store


# ----------------------------------------------------------------------------
# Wrapper: host-side algebraic folding (BN1/BN2, conv_out/feat/combiner,
# conv-as-banded-matmul, average pool) + the two pallas_calls
# ----------------------------------------------------------------------------
def ar_model_forward(signals, feats, p, *, tile_n=None):
    S, B, C, T = signals.shape
    F = feats.shape[-1]
    H, _, K = p["conv_w"].shape
    T_out = T - K + 1
    N = S * B
    f32 = jnp.float32

    if tile_n is None:
        tile_n = min(128, ((N + 7) // 8) * 8)
    assert tile_n % 8 == 0
    n_pad = pl.cdiv(N, tile_n) * tile_n
    n_tiles = n_pad // tile_n

    # ---- fold BN1/BN2 (inference) and conv_out/feat linears into the combiner ----
    s1 = p["bn1_g"] / jnp.sqrt(p["bn1_v"] + EPS)            # BN1 scale
    t1 = p["bn1_b"] - p["bn1_m"] * s1                       # BN1 shift
    s2 = p["bn2_g"] / jnp.sqrt(p["bn2_v"] + EPS)            # BN2 scale
    t2 = p["bn2_b"] - p["bn2_m"] * s2                       # BN2 shift

    w_cb_a = p["comb_w"][:, :45].T                          # (45, 10)
    w_cb_b = p["comb_w"][:, 45:].T                          # (15, 10)

    w_cf = (p["conv_out_w"].T @ w_cb_a) * s2[None, :]                        # (H, 10)
    w_ff = ((s1[:, None] * p["feat_w"].T) @ w_cb_b) * s2[None, :]            # (F, 10)
    b_cmb = ((p["conv_out_b"] @ w_cb_a)
             + (t1 @ p["feat_w"].T + p["feat_b"]) @ w_cb_b
             + p["comb_b"]) * s2 + t2                                        # (10,)

    # ---- conv as one dense banded matmul on the raw (C*T) signal row ----
    #   w_band[c*T + tau, h*T_out + t] = conv_w[h, c, tau - t]  for 0 <= tau-t < K
    w = p["conv_w"]                                         # (H, C, K)
    eye = jnp.eye(T_out, dtype=f32)
    w_band4 = jnp.zeros((C, T, H, T_out), f32)
    for k in range(K):
        w_band4 = w_band4.at[:, k:k + T_out, :, :].add(
            jnp.transpose(w[:, :, k])[:, None, :, None] * eye[None, :, None, :])
    w_band = w_band4.reshape(C * T, H * T_out)
    b_conv_rep = jnp.repeat(p["conv_b"], T_out).reshape(1, H * T_out)
    # average-pool folded into the (already folded) conv_out/combiner weights
    w_pc = jnp.repeat(w_cf, T_out, axis=0) * (1.0 / T_out)  # (H*T_out, 10)

    w_ih_t = p["w_ih"].T                                    # (10, 8)
    b_lstm = (p["b_ih"] + p["b_hh"]).reshape(1, 8)
    w_hh_row = p["w_hh"].T                                  # (1, 8)
    w_hr = p["w_hr"]                                        # (1, 2)

    # ---- host glue is now just reshape + pad (no im2col, no transposes) ----
    x_flat = signals.reshape(N, C * T).astype(f32)
    feats2 = feats.reshape(N, F).astype(f32)
    if n_pad != N:
        x_flat = jnp.pad(x_flat, ((0, n_pad - N), (0, 0)))
        feats2 = jnp.pad(feats2, ((0, n_pad - N), (0, 0)))

    gx = pl.pallas_call(
        encoder_kernel,
        out_shape=jax.ShapeDtypeStruct((n_pad, 8), f32),
        grid=(n_tiles,),
        in_specs=[
            pl.BlockSpec((tile_n, C * T), lambda i: (i, 0)),
            pl.BlockSpec((tile_n, F), lambda i: (i, 0)),
            pl.BlockSpec((C * T, H * T_out), lambda i: (0, 0)),
            pl.BlockSpec((1, H * T_out), lambda i: (0, 0)),
            pl.BlockSpec((H * T_out, 10), lambda i: (0, 0)),
            pl.BlockSpec((F, 10), lambda i: (0, 0)),
            pl.BlockSpec((1, 10), lambda i: (0, 0)),
            pl.BlockSpec((10, 8), lambda i: (0, 0)),
            pl.BlockSpec((1, 8), lambda i: (0, 0)),
        ],
        out_specs=pl.BlockSpec((tile_n, 8), lambda i: (i, 0)),
        compiler_params=pltpu.CompilerParams(
            dimension_semantics=("parallel",)),
    )(x_flat, feats2, w_band, b_conv_rep, w_pc, w_ff,
      b_cmb.reshape(1, 10), w_ih_t, b_lstm)

    gx_seq = gx[:N].reshape(S, B, 8)

    vmem = pl.BlockSpec(memory_space=pltpu.MemorySpace.VMEM)
    out_bs = pl.pallas_call(
        lstm_kernel,
        out_shape=jax.ShapeDtypeStruct((B, S), f32),
        in_specs=[vmem, vmem, vmem],
        out_specs=vmem,
    )(gx_seq, w_hh_row, w_hr)

    return out_bs.T                                         # (S, B)


# ----------------------------------------------------------------------------
# Pure-JAX reference (for correctness check)
# ----------------------------------------------------------------------------
def reference_forward(signals, feats, p):
    S, B, C, T = signals.shape
    H, _, K = p["conv_w"].shape
    T_out = T - K + 1
    x = signals.reshape(S * B, C, T)
    conv = jnp.zeros((S * B, H, T_out), jnp.float32)
    for k in range(K):
        conv = conv + jnp.einsum("nct,hc->nht", x[:, :, k:k + T_out],
                                 p["conv_w"][:, :, k])
    conv = jax.nn.relu(conv + p["conv_b"][None, :, None])
    pooled = conv.mean(-1)
    conved = pooled @ p["conv_out_w"].T + p["conv_out_b"]
    f = feats.reshape(S * B, -1)
    f = (f - p["bn1_m"]) / jnp.sqrt(p["bn1_v"] + EPS) * p["bn1_g"] + p["bn1_b"]
    fe = f @ p["feat_w"].T + p["feat_b"]
    both = jnp.concatenate([conved, fe], -1)
    c = both @ p["comb_w"].T + p["comb_b"]
    c = (c - p["bn2_m"]) / jnp.sqrt(p["bn2_v"] + EPS) * p["bn2_g"] + p["bn2_b"]
    z = (c * jax.nn.sigmoid(c)).reshape(S, B, 10)

    h = jnp.zeros((B, 1)); cc = jnp.zeros((B, 2)); outs = []
    for s in range(S):
        gates = z[s] @ p["w_ih"].T + p["b_ih"] + h @ p["w_hh"].T + p["b_hh"]
        i = jax.nn.sigmoid(gates[:, 0:2]); ff = jax.nn.sigmoid(gates[:, 2:4])
        g = jnp.tanh(gates[:, 4:6]); o = jax.nn.sigmoid(gates[:, 6:8])
        cc = ff * cc + i * g
        h = (o * jnp.tanh(cc)) @ p["w_hr"].T
        outs.append(h)
    return jnp.stack(outs).reshape(S, B)


def init_params(key, C, F, H, K):
    ks = jax.random.split(key, 24)
    n = lambda k, s, sc=0.2: sc * jax.random.normal(k, s, jnp.float32)
    return {
        "conv_w": n(ks[0], (H, C, K)),       "conv_b": n(ks[1], (H,)),
        "conv_out_w": n(ks[2], (45, H)),     "conv_out_b": n(ks[3], (45,)),
        "bn1_g": 1.0 + n(ks[4], (F,), 0.1),  "bn1_b": n(ks[5], (F,)),
        "bn1_m": n(ks[6], (F,)),             "bn1_v": 1.0 + jnp.abs(n(ks[7], (F,))),
        "feat_w": n(ks[8], (15, F)),         "feat_b": n(ks[9], (15,)),
        "comb_w": n(ks[10], (10, 60)),       "comb_b": n(ks[11], (10,)),
        "bn2_g": 1.0 + n(ks[12], (10,), 0.1), "bn2_b": n(ks[13], (10,)),
        "bn2_m": n(ks[14], (10,)),           "bn2_v": 1.0 + jnp.abs(n(ks[15], (10,))),
        "w_ih": n(ks[16], (8, 10), 0.4),     "w_hh": n(ks[17], (8, 1), 0.4),
        "b_ih": n(ks[18], (8,)),             "b_hh": n(ks[19], (8,)),
        "w_hr": n(ks[20], (1, 2), 0.5),
    }


if __name__ == "__main__":
    S, B, C, T, F = 8, 2, 4, 16, 6     # n_seq, n_batch, n_channels, n_times, n_feats
    H, K = 8, 3                        # cnn_hparams: hidden channels, kernel size

    key = jax.random.PRNGKey(0)
    k1, k2, k3 = jax.random.split(key, 3)
    signals = jax.random.normal(k1, (S, B, C, T), jnp.float32)
    feats = jax.random.normal(k2, (S, B, F), jnp.float32)
    params = init_params(k3, C, F, H, K)

    out = jax.block_until_ready(
        ar_model_forward(signals, feats, params, tile_n=8))   # grid of 2 row-tiles
    assert out.shape == (S, B), out.shape

    ref = reference_forward(signals, feats, params)
    np.testing.assert_allclose(np.asarray(out), np.asarray(ref),
                               rtol=2e-3, atol=1e-3)
    print("KERNEL_OK")
</pallas_src>

<mosaic_0001>
module attributes {stable_mosaic.version = 11 : i64} {
  func.func @encoder_kernel(%arg0: i32, %arg1: memref<8x64xf32, #tpu.memory_space<vmem>>, %arg2: memref<8x6xf32, #tpu.memory_space<vmem>>, %arg3: memref<64x112xf32, #tpu.memory_space<vmem>>, %arg4: memref<1x112xf32, #tpu.memory_space<vmem>>, %arg5: memref<112x10xf32, #tpu.memory_space<vmem>>, %arg6: memref<6x10xf32, #tpu.memory_space<vmem>>, %arg7: memref<1x10xf32, #tpu.memory_space<vmem>>, %arg8: memref<10x8xf32, #tpu.memory_space<vmem>>, %arg9: memref<1x8xf32, #tpu.memory_space<vmem>>, %arg10: memref<8x8xf32, #tpu.memory_space<vmem>>) attributes {dimension_semantics = [#tpu.dimension_semantics<parallel>], iteration_bounds = array<i64: 2>, scalar_prefetch = 0 : i64, scratch_operands = 0 : i64, tpu.core_type = #tpu.core_type<tc>, window_params = [{transform_indices = @transform_0, window_bounds = array<i64: 8, 64>}, {transform_indices = @transform_1, window_bounds = array<i64: 8, 6>}, {pipeline_mode = #tpu.pipeline_mode<synchronous>, transform_indices = @transform_2, window_bounds = array<i64: 64, 112>}, {pipeline_mode = #tpu.pipeline_mode<synchronous>, transform_indices = @transform_3, window_bounds = array<i64: 1, 112>}, {pipeline_mode = #tpu.pipeline_mode<synchronous>, transform_indices = @transform_4, window_bounds = array<i64: 112, 10>}, {pipeline_mode = #tpu.pipeline_mode<synchronous>, transform_indices = @transform_5, window_bounds = array<i64: 6, 10>}, {pipeline_mode = #tpu.pipeline_mode<synchronous>, transform_indices = @transform_6, window_bounds = array<i64: 1, 10>}, {pipeline_mode = #tpu.pipeline_mode<synchronous>, transform_indices = @transform_7, window_bounds = array<i64: 10, 8>}, {pipeline_mode = #tpu.pipeline_mode<synchronous>, transform_indices = @transform_8, window_bounds = array<i64: 1, 8>}, {transform_indices = @transform_9, window_bounds = array<i64: 8, 8>}]} {
    %c0 = arith.constant 0 : index
    %c0_0 = arith.constant 0 : index
    %0 = vector.load %arg1[%c0, %c0_0] : memref<8x64xf32, #tpu.memory_space<vmem>>, vector<8x64xf32>
    %c0_1 = arith.constant 0 : index
    %c0_2 = arith.constant 0 : index
    %1 = vector.load %arg3[%c0_1, %c0_2] : memref<64x112xf32, #tpu.memory_space<vmem>>, vector<64x112xf32>
    %cst = arith.constant dense<0.000000e+00> : vector<8x112xf32>
    %2 = tpu.matmul %0, %1, %cst {dimension_numbers = #tpu.dot_dimension_numbers<[1], [0], [0], [1], [0, 0, 1, 1], [], []>} : vector<8x64xf32>, vector<64x112xf32>, vector<8x112xf32> -> vector<8x112xf32>
    %c0_3 = arith.constant 0 : index
    %c0_4 = arith.constant 0 : index
    %3 = vector.load %arg4[%c0_3, %c0_4] : memref<1x112xf32, #tpu.memory_space<vmem>>, vector<1x112xf32>
    %4 = vector.broadcast %3 : vector<1x112xf32> to vector<8x112xf32>
    %5 = arith.addf %2, %4 : vector<8x112xf32>
    %cst_5 = arith.constant 0.000000e+00 : f32
    %6 = vector.broadcast %cst_5 : f32 to vector<8x112xf32>
    %7 = arith.maximumf %5, %6 : vector<8x112xf32>
    %c0_6 = arith.constant 0 : index
    %c0_7 = arith.constant 0 : index
    %8 = vector.load %arg5[%c0_6, %c0_7] : memref<112x10xf32, #tpu.memory_space<vmem>>, vector<112x10xf32>
    %cst_8 = arith.constant dense<0.000000e+00> : vector<8x10xf32>
    %9 = tpu.matmul %7, %8, %cst_8 {dimension_numbers = #tpu.dot_dimension_numbers<[1], [0], [0], [1], [0, 0, 1, 1], [], []>} : vector<8x112xf32>, vector<112x10xf32>, vector<8x10xf32> -> vector<8x10xf32>
    %c0_9 = arith.constant 0 : index
    %c0_10 = arith.constant 0 : index
    %10 = vector.load %arg2[%c0_9, %c0_10] : memref<8x6xf32, #tpu.memory_space<vmem>>, vector<8x6xf32>
    %c0_11 = arith.constant 0 : index
    %c0_12 = arith.constant 0 : index
    %11 = vector.load %arg6[%c0_11, %c0_12] : memref<6x10xf32, #tpu.memory_space<vmem>>, vector<6x10xf32>
    %cst_13 = arith.constant dense<0.000000e+00> : vector<8x10xf32>
    %12 = tpu.matmul %10, %11, %cst_13 {dimension_numbers = #tpu.dot_dimension_numbers<[1], [0], [0], [1], [0, 0, 1, 1], [], []>} : vector<8x6xf32>, vector<6x10xf32>, vector<8x10xf32> -> vector<8x10xf32>
    %13 = arith.addf %9, %12 : vector<8x10xf32>
    %c0_14 = arith.constant 0 : index
    %c0_15 = arith.constant 0 : index
    %14 = vector.load %arg7[%c0_14, %c0_15] : memref<1x10xf32, #tpu.memory_space<vmem>>, vector<1x10xf32>
    %15 = vector.broadcast %14 : vector<1x10xf32> to vector<8x10xf32>
    %16 = arith.addf %13, %15 : vector<8x10xf32>
    %17 = arith.negf %16 : vector<8x10xf32>
    %18 = math.exp %17 : vector<8x10xf32>
    %cst_16 = arith.constant 1.000000e+00 : f32
    %19 = vector.broadcast %cst_16 : f32 to vector<8x10xf32>
    %20 = arith.addf %19, %18 : vector<8x10xf32>
    %21 = arith.divf %19, %20 : vector<8x10xf32>
    %22 = arith.mulf %16, %21 : vector<8x10xf32>
    %c0_17 = arith.constant 0 : index
    %c0_18 = arith.constant 0 : index
    %23 = vector.load %arg8[%c0_17, %c0_18] : memref<10x8xf32, #tpu.memory_space<vmem>>, vector<10x8xf32>
    %cst_19 = arith.constant dense<0.000000e+00> : vector<8x8xf32>
    %24 = tpu.matmul %22, %23, %cst_19 {dimension_numbers = #tpu.dot_dimension_numbers<[1], [0], [0], [1], [0, 0, 1, 1], [], []>} : vector<8x10xf32>, vector<10x8xf32>, vector<8x8xf32> -> vector<8x8xf32>
    %c0_20 = arith.constant 0 : index
    %c0_21 = arith.constant 0 : index
    %25 = vector.load %arg9[%c0_20, %c0_21] : memref<1x8xf32, #tpu.memory_space<vmem>>, vector<1x8xf32>
    %26 = vector.broadcast %25 : vector<1x8xf32> to vector<8x8xf32>
    %27 = arith.addf %24, %26 : vector<8x8xf32>
    %c0_22 = arith.constant 0 : index
    %c0_23 = arith.constant 0 : index
    %28 = vector.load %arg10[%c0_22, %c0_23] : memref<8x8xf32, #tpu.memory_space<vmem>>, vector<8x8xf32>
    tpu.vector_store %arg10[%c0_22, %c0_23], %27 {strides = array<i32>} : memref<8x8xf32, #tpu.memory_space<vmem>>, vector<8x8xf32>,
    return
  }
  func.func @transform_0(%arg0: i32) -> (i32, i32) {
    %c0_i32 = arith.constant 0 : i32
    %c0_i32_0 = arith.constant 0 : i32
    return %arg0, %c0_i32 : i32, i32
  }
  func.func @transform_1(%arg0: i32) -> (i32, i32) {
    %c0_i32 = arith.constant 0 : i32
    %c0_i32_0 = arith.constant 0 : i32
    return %arg0, %c0_i32 : i32, i32
  }
  func.func @transform_2(%arg0: i32) -> (i32, i32) {
    %c0_i32 = arith.constant 0 : i32
    %c0_i32_0 = arith.constant 0 : i32
    %c0_i32_1 = arith.constant 0 : i32
    return %c0_i32, %c0_i32_0 : i32, i32
  }
  func.func @transform_3(%arg0: i32) -> (i32, i32) {
    %c0_i32 = arith.constant 0 : i32
    %c0_i32_0 = arith.constant 0 : i32
    %c0_i32_1 = arith.constant 0 : i32
    return %c0_i32, %c0_i32_0 : i32, i32
  }
  func.func @transform_4(%arg0: i32) -> (i32, i32) {
    %c0_i32 = arith.constant 0 : i32
    %c0_i32_0 = arith.constant 0 : i32
    %c0_i32_1 = arith.constant 0 : i32
    return %c0_i32, %c0_i32_0 : i32, i32
  }
  func.func @transform_5(%arg0: i32) -> (i32, i32) {
    %c0_i32 = arith.constant 0 : i32
    %c0_i32_0 = arith.constant 0 : i32
    %c0_i32_1 = arith.constant 0 : i32
    return %c0_i32, %c0_i32_0 : i32, i32
  }
  func.func @transform_6(%arg0: i32) -> (i32, i32) {
    %c0_i32 = arith.constant 0 : i32
    %c0_i32_0 = arith.constant 0 : i32
    %c0_i32_1 = arith.constant 0 : i32
    return %c0_i32, %c0_i32_0 : i32, i32
  }
  func.func @transform_7(%arg0: i32) -> (i32, i32) {
    %c0_i32 = arith.constant 0 : i32
    %c0_i32_0 = arith.constant 0 : i32
    %c0_i32_1 = arith.constant 0 : i32
    return %c0_i32, %c0_i32_0 : i32, i32
  }
  func.func @transform_8(%arg0: i32) -> (i32, i32) {
    %c0_i32 = arith.constant 0 : i32
    %c0_i32_0 = arith.constant 0 : i32
    %c0_i32_1 = arith.constant 0 : i32
    return %c0_i32, %c0_i32_0 : i32, i32
  }
  func.func @transform_9(%arg0: i32) -> (i32, i32) {
    %c0_i32 = arith.constant 0 : i32
    %c0_i32_0 = arith.constant 0 : i32
    return %arg0, %c0_i32 : i32, i32
  }
}

</mosaic_0001>

<bundles_post_ra>
// kernel: tpu_custom_call.1
= control target key start
LH: loop header
LB: loop body
LE: loop exit
PB: predicated region body
PF: predicated region fallthrough
CT: control target
= control target key end

     0   :  { %s999_s30 = smov 0   ;;  %s1129_s0 = inlined_call_operand.vmem [shape: f32[16,64], index: 0, kind: input, shape index: {}]   ;;  %s1130_s1 = inlined_call_operand.vmem [shape: f32[16,6], index: 1, kind: input, shape index: {}]   ;;  %s1131_s2 = inlined_call_operand.vmem [shape: f32[64,112], index: 2, kind: input, shape index: {}]   ;;  %s1132_s3 = inlined_call_operand.vmem [shape: f32[1,112], index: 3, kind: input, shape index: {}]   ;;  %s1133_s4 = inlined_call_operand.vmem [shape: f32[112,10], index: 4, kind: input, shape index: {}]   ;;  %s1134_s5 = inlined_call_operand.vmem [shape: f32[6,10], index: 5, kind: input, shape index: {}]   ;;  %s1135_s6 = inlined_call_operand.vmem [shape: f32[1,10], index: 6, kind: input, shape index: {}]   ;;  %s1136_s7 = inlined_call_operand.vmem [shape: f32[10,8], index: 7, kind: input, shape index: {}]   ;;  %s1137_s8 = inlined_call_operand.vmem [shape: f32[1,8], index: 8, kind: input, shape index: {}]   ;;  %s1138_s9 = inlined_call_operand.vmem [shape: f32[16,8], index: 9, kind: output, shape index: {}]  }
   0x1 LB: > { %s773_s10 = sadd.s32 4294967295, %s943_s30   ;;  %p777_p0 = scmp.ge.s32.totalorder %s943_s30, 1  ;;  %s943_s30 = sphi %s999_s30, %s19_s30  }
   0x2   : > { %p295_p1 = scmp.lt.s32.totalorder %s943_s30, 3 }
   0x4   : > { %p296_p2 = pnand %p777_p0, %p295_p1 }
   0x5   : > { %v346_v0 = vld [vmem:[%s1131_s2] sm:$0xff] (!%p296_p2)  ;;  %v347_v1 = vld [vmem:[%s1131_s2 + $0x8] sm:$0xff] (!%p296_p2)  ;;  %v348_v2 = vld [vmem:[%s1131_s2 + $0x10] sm:$0xff] (!%p296_p2)  ;;  %v945_v3 = vmov (!%p296_p2), 0.0|0.0   ;;  %vm946_vm0 = vmmov (!%p296_p2), 0   ;;  %v947_v6 = vmov (!%p296_p2), 0.0  }
   0x6   : > { %299 = sbr.rel (%p296_p2) target bundleno = 698 (0x2ba), region = 56  ;;  %884 = vmatprep.subr.bf16.mxu0 (!%p296_p2), %v945_v3  ;;  %v885_v4 = vpack.c.bf16 (!%p296_p2), %v347_v1, %v346_v0  ;;  %v349_v5 = vld [vmem:[%s1131_s2 + $0x18] sm:$0xff] (!%p296_p2)  ;;  %838 = vmatprep.mubr.msk.f32.mxu0 (!%p296_p2), %vm946_vm0, %v947_v6  ;;  %p333_p3 = scmp.lt.s32.totalorder (!%p296_p2), %s773_s10, 1  ;;  %v436_v7 = vld [vmem:[%s1133_s4] sm:$0xff] (!%p296_p2)  ;;  %v437_v9 = vld [vmem:[%s1133_s4 + $0x8] sm:$0xff] (!%p296_p2)  ;;  %vm361_vm1 = vcmask (!%p296_p2), 523264  }
   0x7   : > { %896 = vmatprep.subr.bf16.mxu1 (!%p296_p2), %v945_v3  ;;  %874 = vmatprep.mubr.msk.f32.mxu1 (!%p296_p2), %vm946_vm0, %v947_v6  ;;  %v888_v8 = vpack.c.bf16 (!%p296_p2), %v349_v5, %v348_v2  ;;  %v438_v10 = vld [vmem:[%s1133_s4 + $0x10] sm:$0xff] (!%p296_p2)  ;;  %v439_v11 = vld [vmem:[%s1133_s4 + $0x18] sm:$0xff] (!%p296_p2)  ;;  %v350_v12 = vld [vmem:[%s1131_s2 + $0x20] sm:$0xff] (!%p296_p2)  ;;  %v897_v14 = vpack.c.bf16 (!%p296_p2), %v437_v9, %v436_v7  ;;  %vm456_vm2 = vcmask (!%p296_p2), 1045504   ;;  %vm452_vm3 = vcmask (!%p296_p2), 48128  }
   0x8   : > { %886 = vmatpush3.bf16.msra.mxu0 (!%p296_p2), %v885_v4  ;;  %v351_v13 = vld [vmem:[%s1131_s2 + $0x28] sm:$0xff] (!%p296_p2)  ;;  %v900_v15 = vpack.c.bf16 (!%p296_p2), %v439_v11, %v438_v10  ;;  %v440_v17 = vld [vmem:[%s1133_s4 + $0x20] sm:$0xff] (!%p296_p2)  ;;  %v352_v19 = vld [vmem:[%s1131_s2 + $0x30] sm:$0xff] (!%p296_p2)  ;;  %vm530_vm4 = vcmask (!%p296_p2), 916480   ;;  %vm632_vm5 = vcmask (!%p296_p2), 1041408   ;;  %vm948_vm6 = vmmov (!%p296_p2), 1  }
   0x9   : > { %887 = vmatprep.subr.bf16.mxu0 (!%p296_p2), %v945_v3  ;;  %898 = vmatpush3.bf16.msra.mxu1 (!%p296_p2), %v897_v14  ;;  %v891_v16 = vpack.c.bf16 (!%p296_p2), %v351_v13, %v350_v12  ;;  %v441_v18 = vld [vmem:[%s1133_s4 + $0x28] sm:$0xff] (!%p296_p2)  ;;  %v353_v20 = vld [vmem:[%s1131_s2 + $0x38] sm:$0xff] (!%p296_p2)  ;;  %v442_v23 = vld [vmem:[%s1133_s4 + $0x30] sm:$0xff] (!%p296_p2)  ;;  %vm628_vm8 = vcmask (!%p296_p2), 80896   ;;  %vm706_vm9 = vcmask (!%p296_p2), 64512  }
   0xa   : > { %899 = vmatprep.subr.bf16.mxu1 (!%p296_p2), %v945_v3  ;;  %v903_v21 = vpack.c.bf16 (!%p296_p2), %v441_v18, %v440_v17  ;;  %v894_v22 = vpack.c.bf16 (!%p296_p2), %v353_v20, %v352_v19  ;;  %v443_v24 = vld [vmem:[%s1133_s4 + $0x38] sm:$0xff] (!%p296_p2)  ;;  %v444_v27 = vld [vmem:[%s1133_s4 + $0x40] sm:$0xff] (!%p296_p2)  ;;  %v445_v28 = vld [vmem:[%s1133_s4 + $0x48] sm:$0xff] (!%p296_p2) }
   0xb   : > { %v906_v25 = vpack.c.bf16 (!%p296_p2), %v443_v24, %v442_v23  ;;  %v909_v29 = vpack.c.bf16 (!%p296_p2), %v445_v28, %v444_v27  ;;  %v446_v30 = vld [vmem:[%s1133_s4 + $0x50] sm:$0xff] (!%p296_p2)  ;;  %v447_v31 = vld [vmem:[%s1133_s4 + $0x58] sm:$0xff] (!%p296_p2)  ;;  %v448_v33 = vld [vmem:[%s1133_s4 + $0x60] sm:$0xff] (!%p296_p2) }
   0xc   : > { %889 = vmatpush3.bf16.msra.mxu0 (!%p296_p2), %v888_v8  ;;  %v912_v32 = vpack.c.bf16 (!%p296_p2), %v447_v31, %v446_v30  ;;  %v449_v34 = vld [vmem:[%s1133_s4 + $0x68] sm:$0xff] (!%p296_p2)  ;;  %v451_v36 = vld [vmem:[%s1134_s5] sm:$0x3f] (!%p296_p2)  ;;  %vm919_vm7 = vmpackc.low (!%p296_p2), %vm632_vm5, %vm948_vm6 }
   0xd   : > { %s1140_s10 = smov (!%p333_p3, %s773_s10), 1  ;;  %890 = vmatprep.subr.bf16.mxu0 %v945_v3  ;;  %901 = vmatpush3.bf16.msra.mxu1 %v900_v15  ;;  %v915_v35 = vpack.c.bf16 %v449_v34, %v448_v33  ;;  %v781_v38 = vld [vmem:[%s1132_s3] ss:$0 sm:$0xff]  ;;  %v620_v46 = vld [vmem:[%s1136_s7 + $0x8] sm:$0x3] }
   0xe   : > { %s1058_s20 = sshll.u32 %s1140_s10, 3  ;;  %902 = vmatprep.subr.bf16.mxu1 %v945_v3  ;;  %v619_v45 = vld [vmem:[%s1136_s7] sm:$0xff] }
   0xf   : > { %s336_s26 = scalar_lea.vmem %s1129_s0, %s1058_s20  ;;  %s340_s25 = scalar_lea.vmem %s1130_s1, %s1058_s20  ;;  %v918_v47 = vpack.c.bf16 %v620_v46, %v619_v45  ;;  %v786_v49 = vld [vmem:[%s1135_s6] ss:$0 sm:$0xff] }
  0x10   : > { %892 = vmatpush3.bf16.msra.mxu0 %v891_v16  ;;  %v345_v26 = vld [vmem:[%s336_s26] sm:$0xff]  ;;  %s344_s18 = scalar_lea.vmem %s1138_s9, %s1058_s20 }
  0x11   : > { %893 = vmatprep.subr.bf16.mxu0 %v945_v3  ;;  %904 = vmatpush3.bf16.msra.mxu1 %v903_v21  ;;  %v450_v37 = vld [vmem:[%s340_s25] sm:$0xff] }
  0x12   : > { %905 = vmatprep.subr.bf16.mxu1 %v945_v3  ;;  %v788_v58 = vld [vmem:[%s1137_s8] ss:$0 sm:$0xff] }
  0x14   : > { %895 = vmatpush3.bf16.msra.mxu0 %v894_v22 }
  0x15   : > { %841 = vmatprep.subr.mxu0 %v947_v6  ;;  %907 = vmatpush3.bf16.msra.mxu1 %v906_v25 }
  0x16   : > { %908 = vmatprep.subr.bf16.mxu1 %v945_v3 }
  0x17   : > { %839 = vmatmul.mubr.msk.f32.vlgmr.msra.gmra.mrb[0].mxu0 %vm361_vm1, %v345_v26 }
  0x18   : > { %843 = vmatprep.mubr.msk.f32.mxu0 %vm946_vm0, %v947_v6  ;;  %842 = vmatpush3.msk.msra.mxu0 %vm456_vm2, %v451_v36 }
  0x19   : > { %910 = vmatpush3.bf16.msra.mxu1 %v909_v29  ;;  %917 = vmatprep.subr.bf16.mxu0 %v945_v3 }
  0x1a   : > { %911 = vmatprep.subr.bf16.mxu1 %v945_v3 }
  0x1b   : > { %844 = vmatmul.mubr.msk.f32.vlgmr.msra.gmra.mrb[2].mxu0 %vm452_vm3, %v450_v37 }
  0x1c   : > { %881 = vmatprep.mubr.msk.f32.mxu0 %vm946_vm0, %v947_v6  ;;  %920 = vmatpush3.bf16.msk.msra.mxu0 %vm919_vm7, %v918_v47 }
  0x1d   : > { %913 = vmatpush3.bf16.msra.mxu1 %v912_v32 }
  0x1e   : > { %914 = vmatprep.subr.bf16.mxu1 %v945_v3 }
  0x21   : > { %916 = vmatpush3.bf16.msra.mxu1 %v915_v35 }
  0xea   : > { %v431_v39 = vpop.f32.mrb[0].mxu0 }
  0xeb   : > { %v432_v40 = vadd.f32 %v781_v38, %v431_v39  ;;  %v840_v41 = vpop.f32.mrb[1].mxu0 }
  0xed   : > { %v435_v42 = vmax.f32 %v432_v40, 0.0 }
  0xee   : > { %v526_v43 = vpop.f32.mrb[2].mxu0 }
  0xef   : > { %875 = vmatmul.mubr.msk.f32.vlgmr.msra.gmra.mrb[0].mxu1 %vm530_vm4, %v435_v42  ;;  %v845_v44 = vpop.f32.mrb[3].mxu0 }
 0x1c2   : > { %v600_v48 = vpop.f32.mrb[0].mxu1 }
 0x1c3   : > { %v601_v50 = vadd.f32 %v600_v48, %v526_v43  ;;  %v876_v51 = vpop.f32.mrb[1].mxu1 }
 0x1c5   : > { %v611_v52 = vadd.f32 %v786_v49, %v601_v50 }
 0x1c7   : > { %v787_v53 = vmul.f32 -1.442695, %v611_v52 }
 0x1c9   : > { %933 = vpow2.f32 %v787_v53 }
 0x1d3   : > { %v934_v54 = vpop.eup %933 }
 0x1d4   : > { %v615_v55 = vadd.f32 1.0, %v934_v54 }
 0x1d6   : > { %935 = vrcp.f32 %v615_v55 }
 0x1e0   : > { %v936_v56 = vpop.eup %935 }
 0x1e1   : > { %v618_v57 = vmul.f32 %v936_v56, %v611_v52 }
 0x1e3   : > { %882 = vmatmul.mubr.msk.f32.vlgmr.msra.gmra.mrb[4].mxu0 %vm628_vm8, %v618_v57 }
 0x2b6   : > { %v702_v59 = vpop.f32.mrb[4].mxu0 }
 0x2b7   : > { %v703_v60 = vadd.f32 %v788_v58, %v702_v59  ;;  %v883_v61 = vpop.f32.mrb[5].mxu0 }
 0x2b9   : > { %707 = vst.msk [vmem:[%s344_s18] sm:$0xff] %vm706_vm9, %v703_v60 }
 0x2ba PF: > { %s19_s30 = sadd.s32 1, %s943_s30  }
 0x2bb   : > { %p16_p4 = scmp.ge.s32.totalorder %s19_s30, 4  }
 0x2bd   :  { %18 = sbr.rel (!%p16_p4) target bundleno = 1 (0x1), region = 89 }

</bundles_post_ra>
